<compile_context>
chip_gen: v5e
topology: v5e:2x2
jax: 0.10.0
libtpu: 0.0.40
codegen_flags: <defaults>
</compile_context>

<pallas_src>
import jax
import jax.numpy as jnp
from jax.experimental import pallas as pl
from jax.experimental.pallas import tpu as pltpu

EPS = 1e-5  # nn.BatchNorm2d default eps


# ---------------- Pallas kernel ----------------

def _bn_apply_kernel(x_ref, gamma_ref, beta_ref, o_ref):
    """One feature-tile of conditional batch norm.

    x_ref:     (b, TF, HW)
    gamma_ref: (b, TF, 1)   per-(batch, feature) scale from the embedding
    beta_ref:  (b, TF, 1)   per-(batch, feature) shift from the embedding
    o_ref:     (b, TF, HW)
    """
    x = x_ref[...].astype(jnp.float32)
    n = x.shape[0] * x.shape[2]
    inv_n = 1.0 / n
    # one-pass fused stats (f32 accumulation): sum(x) and sum(x*x) together,
    # var = E[x^2] - mean^2, clamped at 0 for numerical safety.
    s = jnp.sum(x, axis=(0, 2), keepdims=True)                      # (1, TF, 1)
    sq = jnp.sum(x * x, axis=(0, 2), keepdims=True)                 # (1, TF, 1)
    mean = s * inv_n
    var = jnp.maximum(sq * inv_n - mean * mean, 0.0)
    inv_std = jax.lax.rsqrt(var + EPS)
    # fold the conditional affine into the normalization constants
    scale = gamma_ref[...].astype(jnp.float32) * inv_std            # (b, TF, 1)
    shift = beta_ref[...].astype(jnp.float32) - mean * scale        # (b, TF, 1)
    o_ref[...] = (x * scale + shift).astype(o_ref.dtype)


# ---------------- tiling helper ----------------

def _pick_feature_tile(F, b, hw, dtype_bytes, vmem_budget_bytes=10 * 1024 * 1024):
    """Pick the feature-tile size.

    Budget model per feature row:
        2 (double-buffer) x 2 (input + output) x b x hw x itemsize
      + 2 f32 tile-sized compute temporaries (the upcast copy and x*x).

    The tile is additionally capped so the grid has >=4 tiles (>=2 when F is
    small) even when the whole problem would fit the VMEM budget: grid=(1,)
    has nothing to pipeline and leaves one v7x TensorCore idle.

    Returns a multiple of 8 (f32 sublane rule) or F itself. The result need
    not divide F — the wrapper uses a pl.cdiv grid; the ragged last tile is
    safe because feature rows are independent and OOB writes are discarded.
    """
    if F < 8:
        return F  # (8,128) rule only allows tile_f == F here
    per_feature = 4 * b * hw * max(dtype_bytes, 1) + 2 * b * hw * 4
    cap_budget = max(8, (vmem_budget_bytes // max(per_feature, 1)) // 8 * 8)
    desired_tiles = 4 if F >= 32 else 2
    cap_pipe = max(8, (F // desired_tiles) // 8 * 8)
    cap = min(cap_budget, cap_pipe, (F // 8) * 8)
    # largest multiple-of-8 divisor of F within the cap
    best_div = 0
    for tf in range(cap, 7, -8):
        if F % tf == 0:
            best_div = tf
            break
    # accept the divisor only if it is "healthy" (within 2x of the cap);
    # otherwise use a non-divisor tile with a ragged cdiv grid instead of
    # degenerating to a tiny tile when F has awkward factors.
    if best_div >= max(8, cap // 2):
        return best_div
    return cap


# ---------------- wrapper ----------------

def conditional_batchnorm2d(x, class_id, embed_w, embed_b, *, n_frame, tile_f=None):
    """ConditionalBatchNorm2d forward (sep_time_dim=True).

    x:        (b*T, C, H, W)
    class_id: (b, dim_cond)
    embed_w:  (2F, dim_cond)  where F = T*C   (PyTorch nn.Linear weight layout)
    embed_b:  (2F,)
    returns:  (b*T, C, H, W)
    """
    BT, C, H, W = x.shape
    b = BT // n_frame
    F = n_frame * C
    HW = H * W
    itemsize = jnp.dtype(x.dtype).itemsize

    # conditioning embedding: tiny matmul, keep it in plain XLA
    embed = (class_id.astype(jnp.float32) @ embed_w.T.astype(jnp.float32)
             + embed_b.astype(jnp.float32))                        # (b, 2F)
    gamma = embed[:, :F].reshape(b, F, 1)
    beta = embed[:, F:].reshape(b, F, 1)

    x3 = x.reshape(b, F, HW)                                       # (batch, feature, spatial)

    if tile_f is None:
        tile_f = _pick_feature_tile(F, b, HW, itemsize)
    # (8,128) lowering contract: tile must be sublane-aligned or the full axis
    assert tile_f == F or (tile_f % 8 == 0 and tile_f <= F), (F, tile_f)
    grid = (pl.cdiv(F, tile_f),)

    cost = pl.CostEstimate(
        flops=6 * b * F * HW,
        transcendentals=F,                      # one rsqrt per feature
        bytes_accessed=2 * b * F * HW * itemsize + 2 * b * F * 4,
    )

    out = pl.pallas_call(
        _bn_apply_kernel,
        out_shape=jax.ShapeDtypeStruct((b, F, HW), x.dtype),
        grid=grid,
        in_specs=[
            pl.BlockSpec((b, tile_f, HW), lambda j: (0, j, 0)),
            pl.BlockSpec((b, tile_f, 1), lambda j: (0, j, 0)),
            pl.BlockSpec((b, tile_f, 1), lambda j: (0, j, 0)),
        ],
        out_specs=pl.BlockSpec((b, tile_f, HW), lambda j: (0, j, 0)),
        compiler_params=pltpu.CompilerParams(
            dimension_semantics=("parallel",),
            vmem_limit_bytes=32 * 1024 * 1024),
        cost_estimate=cost,
        # TODO(synk): add input_output_aliases={0: 0} when the caller can donate x
        # (not done here because the reference re-reads x afterwards).
    )(x3, gamma, beta)
    return out.reshape(BT, C, H, W)


# ---------------- pure-JAX reference ----------------

def reference(x, class_id, embed_w, embed_b, n_frame):
    BT, C, H, W = x.shape
    b = BT // n_frame
    F = n_frame * C
    xr = x.reshape(b, F, H, W).astype(jnp.float32)
    mean = xr.mean(axis=(0, 2, 3), keepdims=True)
    var = ((xr - mean) ** 2).mean(axis=(0, 2, 3), keepdims=True)
    xn = (xr - mean) / jnp.sqrt(var + EPS)
    embed = class_id @ embed_w.T + embed_b
    gamma = embed[:, :F].reshape(b, F, 1, 1)
    beta = embed[:, F:].reshape(b, F, 1, 1)
    return (gamma * xn + beta).reshape(BT, C, H, W).astype(x.dtype)


if __name__ == "__main__":
    # small shapes consistent with the module
    b, T, C, H, W = 2, 2, 8, 16, 16
    dim_cond = 8
    F = T * C                                    # n_feature (sep_time_dim=True)

    key = jax.random.PRNGKey(0)
    k_x, k_c, k_w, k_b = jax.random.split(key, 4)

    x = jax.random.normal(k_x, (b * T, C, H, W), jnp.float32)
    class_id = jax.random.normal(k_c, (b, dim_cond), jnp.float32)

    # deterministic init mirroring the PyTorch __init__:
    #   embed.weight[:, :n_feature] ~ N(1, 0.02), embed.weight[:, n_feature:] = 0
    embed_w = jnp.zeros((2 * F, dim_cond), jnp.float32)
    ncols = min(F, dim_cond)
    embed_w = embed_w.at[:, :ncols].set(
        1.0 + 0.02 * jax.random.normal(k_w, (2 * F, ncols), jnp.float32))
    bound = 1.0 / (dim_cond ** 0.5)              # nn.Linear default bias init
    embed_b = jax.random.uniform(k_b, (2 * F,), jnp.float32, -bound, bound)

    ref = reference(x, class_id, embed_w, embed_b, T)

    # default path: auto-picked tile -> tile_f=8, grid=(2,) (pipelined, 2 TCs)
    out = conditional_batchnorm2d(x, class_id, embed_w, embed_b, n_frame=T)
    out = jax.block_until_ready(out)
    assert out.shape == (b * T, C, H, W)
    assert jnp.allclose(out, ref, rtol=1e-4, atol=1e-4), \
        float(jnp.max(jnp.abs(out - ref)))

    # also exercise the full-feature-axis (single tile) path
    out_full = conditional_batchnorm2d(
        x, class_id, embed_w, embed_b, n_frame=T, tile_f=F)
    out_full = jax.block_until_ready(out_full)
    assert jnp.allclose(out_full, ref, rtol=1e-4, atol=1e-4), \
        float(jnp.max(jnp.abs(out_full - ref)))

    print("KERNEL_OK")
</pallas_src>

<mosaic_0001>
module attributes {stable_mosaic.version = 11 : i64} {
  func.func @_bn_apply_kernel(%arg0: i32, %arg1: memref<2x8x256xf32, #tpu.memory_space<vmem>>, %arg2: memref<2x8x1xf32, #tpu.memory_space<vmem>>, %arg3: memref<2x8x1xf32, #tpu.memory_space<vmem>>, %arg4: memref<2x8x256xf32, #tpu.memory_space<vmem>>) attributes {dimension_semantics = [#tpu.dimension_semantics<parallel>], iteration_bounds = array<i64: 2>, scalar_prefetch = 0 : i64, scratch_operands = 0 : i64, tpu.core_type = #tpu.core_type<tc>, window_params = [{transform_indices = @transform_0, window_bounds = array<i64: 2, 8, 256>}, {transform_indices = @transform_1, window_bounds = array<i64: 2, 8, 1>}, {transform_indices = @transform_2, window_bounds = array<i64: 2, 8, 1>}, {transform_indices = @transform_3, window_bounds = array<i64: 2, 8, 256>}]} {
    %c0 = arith.constant 0 : index
    %c0_0 = arith.constant 0 : index
    %c0_1 = arith.constant 0 : index
    %0 = vector.load %arg1[%c0, %c0_0, %c0_1] : memref<2x8x256xf32, #tpu.memory_space<vmem>>, vector<2x8x256xf32>
    %cst = arith.constant dense<0.000000e+00> : vector<8xf32>
    %1 = vector.multi_reduction <add>, %0, %cst [0, 2] : vector<2x8x256xf32> to vector<8xf32>
    %2 = vector.shape_cast %1 : vector<8xf32> to vector<1x8x1xf32>
    %3 = arith.mulf %0, %0 : vector<2x8x256xf32>
    %cst_2 = arith.constant dense<0.000000e+00> : vector<8xf32>
    %4 = vector.multi_reduction <add>, %3, %cst_2 [0, 2] : vector<2x8x256xf32> to vector<8xf32>
    %5 = vector.shape_cast %4 : vector<8xf32> to vector<1x8x1xf32>
    %cst_3 = arith.constant 0.001953125 : f32
    %6 = vector.broadcast %cst_3 : f32 to vector<1x8x1xf32>
    %7 = arith.mulf %2, %6 : vector<1x8x1xf32>
    %cst_4 = arith.constant 0.001953125 : f32
    %8 = vector.broadcast %cst_4 : f32 to vector<1x8x1xf32>
    %9 = arith.mulf %5, %8 : vector<1x8x1xf32>
    %10 = arith.mulf %7, %7 : vector<1x8x1xf32>
    %11 = arith.subf %9, %10 : vector<1x8x1xf32>
    %cst_5 = arith.constant 0.000000e+00 : f32
    %12 = vector.broadcast %cst_5 : f32 to vector<1x8x1xf32>
    %13 = arith.maximumf %11, %12 : vector<1x8x1xf32>
    %cst_6 = arith.constant 9.99999974E-6 : f32
    %14 = vector.broadcast %cst_6 : f32 to vector<1x8x1xf32>
    %15 = arith.addf %13, %14 : vector<1x8x1xf32>
    %16 = math.rsqrt %15 : vector<1x8x1xf32>
    %c0_7 = arith.constant 0 : index
    %c0_8 = arith.constant 0 : index
    %c0_9 = arith.constant 0 : index
    %17 = vector.load %arg2[%c0_7, %c0_8, %c0_9] : memref<2x8x1xf32, #tpu.memory_space<vmem>>, vector<2x8x1xf32>
    %18 = vector.broadcast %16 : vector<1x8x1xf32> to vector<2x8x1xf32>
    %19 = arith.mulf %17, %18 : vector<2x8x1xf32>
    %c0_10 = arith.constant 0 : index
    %c0_11 = arith.constant 0 : index
    %c0_12 = arith.constant 0 : index
    %20 = vector.load %arg3[%c0_10, %c0_11, %c0_12] : memref<2x8x1xf32, #tpu.memory_space<vmem>>, vector<2x8x1xf32>
    %21 = vector.broadcast %7 : vector<1x8x1xf32> to vector<2x8x1xf32>
    %22 = arith.mulf %21, %19 : vector<2x8x1xf32>
    %23 = arith.subf %20, %22 : vector<2x8x1xf32>
    %24 = vector.broadcast %19 : vector<2x8x1xf32> to vector<2x8x256xf32>
    %25 = arith.mulf %0, %24 : vector<2x8x256xf32>
    %26 = vector.broadcast %23 : vector<2x8x1xf32> to vector<2x8x256xf32>
    %27 = arith.addf %25, %26 : vector<2x8x256xf32>
    %c0_13 = arith.constant 0 : index
    %c0_14 = arith.constant 0 : index
    %c0_15 = arith.constant 0 : index
    %28 = vector.load %arg4[%c0_13, %c0_14, %c0_15] : memref<2x8x256xf32, #tpu.memory_space<vmem>>, vector<2x8x256xf32>
    tpu.vector_store %arg4[%c0_13, %c0_14, %c0_15], %27 {strides = array<i32>} : memref<2x8x256xf32, #tpu.memory_space<vmem>>, vector<2x8x256xf32>,
    return
  }
  func.func @transform_0(%arg0: i32) -> (i32, i32, i32) {
    %c0_i32 = arith.constant 0 : i32
    %c0_i32_0 = arith.constant 0 : i32
    %c0_i32_1 = arith.constant 0 : i32
    return %c0_i32, %arg0, %c0_i32_0 : i32, i32, i32
  }
  func.func @transform_1(%arg0: i32) -> (i32, i32, i32) {
    %c0_i32 = arith.constant 0 : i32
    %c0_i32_0 = arith.constant 0 : i32
    %c0_i32_1 = arith.constant 0 : i32
    return %c0_i32, %arg0, %c0_i32_0 : i32, i32, i32
  }
  func.func @transform_2(%arg0: i32) -> (i32, i32, i32) {
    %c0_i32 = arith.constant 0 : i32
    %c0_i32_0 = arith.constant 0 : i32
    %c0_i32_1 = arith.constant 0 : i32
    return %c0_i32, %arg0, %c0_i32_0 : i32, i32, i32
  }
  func.func @transform_3(%arg0: i32) -> (i32, i32, i32) {
    %c0_i32 = arith.constant 0 : i32
    %c0_i32_0 = arith.constant 0 : i32
    %c0_i32_1 = arith.constant 0 : i32
    return %c0_i32, %arg0, %c0_i32_0 : i32, i32, i32
  }
}

</mosaic_0001>

<bundles_post_ra>
// kernel: tpu_custom_call.1
= control target key start
LH: loop header
LB: loop body
LE: loop exit
PB: predicated region body
PF: predicated region fallthrough
CT: control target
= control target key end

     0   :  { %8 = vsyncpa [#allocation6], 0  ;;  %s801_s0 = inlined_call_operand.vmem [shape: f32[2,16,256], index: 0, kind: input, shape index: {}]   ;;  %s802_s1 = inlined_call_operand.vmem [shape: f32[2,16,1], index: 1, kind: input, shape index: {}]   ;;  %s803_s2 = inlined_call_operand.vmem [shape: f32[2,16,1], index: 2, kind: input, shape index: {}]   ;;  %s804_s3 = inlined_call_operand.hbm [shape: f32[2,16,256], index: 3, kind: output, shape index: {}]  }
   0x1   :  { %10 = vsyncpa [#allocation6 + $0x1], 0  ;;  %s667_s12 = smov 0   ;;  %s669_s13 = smov 0  }
   0x2   :  { %s671_s14 = smov 0   ;;  %s673_s15 = smov 0  }
   0x3 LB: > { %s508_s16 = sadd.s32 4294967295, %s641_s15   ;;  %s509_s17 = sadd.s32 4294967294, %s641_s15   ;;  %s641_s15 = sphi %s673_s15, %s811_s15   ;;  %s637_s14 = sphi %s671_s14, %s810_s14   ;;  %s633_s13 = sphi %s669_s13, %s809_s13   ;;  %s629_s12 = sphi %s667_s12, %s808_s12  }
   0x4   : > { %s690_s18 = sadd.s32 1, %s641_s15   ;;  %s23_s19 = sadd.s32 1, %s637_s14 }
   0x5   : > { %s20_s20 = ssub.s32 %s641_s15, %s690_s18  ;;  %p30_p0 = scmp.ne.s32.totalorder %s637_s14, %s633_s13 }
   0x6   : > { %p21_p1 = scmp.eq.s32.totalorder %s20_s20, 0  ;;  %p31_p2 = scmp.eq.s32.totalorder %s641_s15, 0 }
   0x7   : > { %p112_p3 = scmp.eq.s32.totalorder %s508_s16, 1  ;;  %p117_p4 = scmp.ne.s32.totalorder %s633_s13, %s629_s12 }
   0x8   : > { %s703_s21 = scalar_select %p21_p1, %s637_s14, %s23_s19  }
   0x9   : > { %p705_p5 = por %p31_p2, %p30_p0  ;;  %p709_p6 = por %p112_p3, %p30_p0 }
   0xa   : > { %p118_p7 = scmp.eq.s32.totalorder %s509_s17, 1  ;;  %p511_p9 = scmp.ge.s32.totalorder %s641_s15, 2 }
   0xc   : > { %p713_p8 = por %p118_p7, %p117_p4  ;;  %134 = sbr.rel (%p511_p9) target bundleno = 37 (0x25), region = 16 }
  0x11   : > { %137 = sbr.rel (!%p705_p5) target bundleno = 25 (0x19), region = 20  ;;  %s139_s25 = sand.u32 (%p705_p5), 1, %s637_s14  }
  0x12   : > { %s529_s26 = sshll.u32 (%p705_p5), %s641_s15, 4  ;;  %s512_s27 = sshll.u32 (%p705_p5), %s139_s25, 5 }
  0x13   : > { %s144_s30 = scalar_lea.vmem (%p705_p5), %s801_s0, %s529_s26  ;;  %s141_s4 = scalar_lea.vmem (%p705_p5), [#allocation2], %s512_s27 }
  0x14   : > { %v157_v0 = vld [vmem:[%s144_s30] sm:$0xff] (%p705_p5)  ;;  %v159_v1 = vld [vmem:[%s144_s30 + $0x8] sm:$0xff] (%p705_p5) }
  0x15   : > { %v161_v2 = vld [vmem:[%s144_s30 + $0x20] sm:$0xff] (%p705_p5)  ;;  %158 = vst [vmem:[%s141_s4] sm:$0xff] (%p705_p5), %v157_v0  ;;  %v163_v3 = vld [vmem:[%s144_s30 + $0x28] sm:$0xff] (%p705_p5) }
  0x16   : > { %160 = vst [vmem:[%s141_s4 + $0x8] sm:$0xff] %v159_v1 }
  0x17   : > { %162 = vst [vmem:[%s141_s4 + $0x10] sm:$0xff] %v161_v2 }
  0x18   : > { %164 = vst [vmem:[%s141_s4 + $0x18] sm:$0xff] %v163_v3 }
  0x19 PF: > { %170 = sbr.rel (!%p705_p5) target bundleno = 31 (0x1f), region = 43  ;;  %s172_s5 = sand.u32 (%p705_p5), 1, %s637_s14  }
  0x1a   : > { %s516_s6 = sshll.u32 (%p705_p5), %s641_s15, 3  ;;  %s515_s7 = sshll.u32 (%p705_p5), %s172_s5, 4 }
  0x1b   : > { %s176_s10 = scalar_lea.vmem (%p705_p5), %s802_s1, %s516_s6  ;;  %s174_s11 = scalar_lea.vmem (%p705_p5), [#allocation3], %s515_s7 }
  0x1c   : > { %v207_v4 = vld [vmem:[%s176_s10] sm:$0xff] (%p705_p5)  ;;  %v209_v5 = vld [vmem:[%s176_s10 + $0x10] sm:$0xff] (%p705_p5) }
  0x1d   : > { %208 = vst [vmem:[%s174_s11] sm:$0xff] (%p705_p5), %v207_v4 }
  0x1e   : > { %210 = vst [vmem:[%s174_s11 + $0x8] sm:$0xff] %v209_v5 }
  0x1f PF: > { %216 = sbr.rel (!%p705_p5) target bundleno = 37 (0x25), region = 81  ;;  %s218_s17 = sand.u32 (%p705_p5), 1, %s637_s14  }
  0x20   : > { %s518_s19 = sshll.u32 (%p705_p5), %s641_s15, 3  ;;  %s517_s20 = sshll.u32 (%p705_p5), %s218_s17, 4 }
  0x21   : > { %s222_s27 = scalar_lea.vmem (%p705_p5), %s803_s2, %s518_s19  ;;  %s220_s28 = scalar_lea.vmem (%p705_p5), [#allocation4], %s517_s20 }
  0x22   : > { %v253_v6 = vld [vmem:[%s222_s27] sm:$0xff] (%p705_p5)  ;;  %v255_v7 = vld [vmem:[%s222_s27 + $0x10] sm:$0xff] (%p705_p5) }
  0x23   : > { %254 = vst [vmem:[%s220_s28] sm:$0xff] (%p705_p5), %v253_v6 }
  0x24   : > { %256 = vst [vmem:[%s220_s28 + $0x8] sm:$0xff] %v255_v7 }
  0x25 PF: > { %p519_p10 = scmp.ge.s32.totalorder %s641_s15, 1  ;;  %p261_p11 = scmp.lt.s32.totalorder %s641_s15, 3 }
  0x27   : > { %p262_p12 = pnand %p519_p10, %p261_p11 }
  0x28   : > { %s744_s22 = sand.u32 (!%p262_p12), 1, %s633_s13   ;;  %s530_s7 = sshll.u32 (!%p262_p12), %s508_s16, 4 }
  0x29   : > { %265 = sbr.rel (%p262_p12) target bundleno = 338 (0x152), region = 119  ;;  %s520_s29 = sshll.u32 (!%p262_p12), %s744_s22, 5 }
  0x2a   : > { %s270_s30 = scalar_lea.vmem (!%p262_p12), [#allocation2], %s520_s29  ;;  %s521_s4 = sshll.u32 (!%p262_p12), %s744_s22, 4 }
  0x2b   : > { %s277_s5 = scalar_lea.vmem (!%p262_p12), [#allocation3], %s521_s4  ;;  %s284_s6 = scalar_lea.vmem (!%p262_p12), [#allocation4], %s521_s4 }
  0x2c   : > { %s312_s8 = scalar_lea.vmem (!%p262_p12), [#allocation5], %s520_s29  ;;  %s401_s11 = scalar_lea.hbm (!%p262_p12), %s804_s3, %s530_s7 }
  0x2d   : > { %s402_s17 = sshll.u32 (!%p262_p12), %s312_s8, 4  ;;  %s767_s19 = sshll.u32 (!%p262_p12), %s401_s11, 4  ;;  %s403_s17 = int_to_ptr.vmem [resolvable:$true] %s402_s17  ;;  %s405_s19 = int_to_ptr.hbm [resolvable:$true] %s767_s19 }
  0x2e   : > { %v313_v8 = vld [vmem:[%s270_s30] sm:$0xff]  ;;  %v314_v9 = vld [vmem:[%s270_s30 + $0x8] sm:$0xff]  ;;  %v749_v10 = vld [vmem:[%s270_s30 + $0x10] sm:$0xff]  ;;  %v643_v22 = vmov 0   ;;  %s390_s16 = scalar_lea.sflag [#allocation6], %s744_s22  ;;  %s593_s20 = sshra.s32 %s405_s19, 4  ;;  %s594_s20 = int_to_ptr.hbm [resolvable:$true] %s593_s20 }
  0x2f   : > { %v317_v11 = vadd.f32 %v314_v9, %v313_v8  ;;  %v322_v12 = vmul.f32 %v313_v8, %v313_v8  ;;  %v323_v13 = vmul.f32 %v314_v9, %v314_v9  ;;  %v751_v14 = vld [vmem:[%s270_s30 + $0x18] sm:$0xff]  ;;  %v324_v16 = vmul.f32 %v749_v10, %v749_v10  ;;  %574 = vset.pattern.permute.xlu1 %v643_v22  ;;  %v347_v37 = vld [vmem:[%s277_s5] sm:$0xff]  ;;  %s595_s25 = scalar_lea.hbm %s594_s20, 32  ;;  %s599_s28 = scalar_lea.hbm %s804_s3, 64 }
  0x30   : > { %v325_v19 = vmul.f32 %v751_v14, %v751_v14  ;;  %575 = vset.pattern.permute.xlu2 %v643_v22  ;;  %576 = vset.pattern.permute.xlu0 %v643_v22  ;;  %v348_v40 = vld [vmem:[%s277_s5 + $0x8] sm:$0xff]  ;;  %v351_v41 = vld [vmem:[%s284_s6] sm:$0xff]  ;;  %p596_p13 = scmp.ne.s32.totalorder %s594_s20, %s595_s25  ;;  %p600_p2 = scmp.lt.s32.totalorder %s594_s20, %s804_s3 }
  0x31   : > { %v318_v15 = vadd.f32 %v317_v11, %v749_v10  ;;  %v326_v17 = vadd.f32 %v323_v13, %v322_v12  ;;  %v352_v46 = vld [vmem:[%s284_s6 + $0x8] sm:$0xff]  ;;  %p601_p3 = scmp.lt.s32.totalorder %s599_s28, %s595_s25 }
  0x32   : > { %p597_p0 = pnand %p596_p13, %p709_p6 }
  0x33   : > { %v319_v18 = vadd.f32 %v318_v15, %v751_v14  ;;  %v327_v20 = vadd.f32 %v326_v17, %v324_v16  ;;  %p602_p4 = por %p601_p3, %p600_p2 }
  0x34   : > { %p598_p1 = pneg %p597_p0 }
  0x35   : > { %320 = vadd.xlane.f32.xlu0 %v319_v18  ;;  %v328_v21 = vadd.f32 %v327_v20, %v325_v19 }
  0x36   : > { %p603_p5 = pnand %p602_p4, %p598_p1 }
  0x3d   : > { %329 = vadd.xlane.f32.xlu0 %v328_v21 }
  0xa8   : > { %v321_v23 = vpop.xlane.xlu0 %320 }
  0xa9   : > { %v331_v24 = vmul.f32 0.001953125, %v321_v23 }
  0xab   : > { %v333_v26 = vmul.f32 %v331_v24, %v331_v24 }
  0xb0   : > { %v330_v25 = vpop.xlane.xlu0 %329 }
  0xb1   : > { %v332_v27 = vmul.f32 0.001953125, %v330_v25 }
  0xb3   : > { %v334_v28 = vsub.f32 %v332_v27, %v333_v26 }
  0xb5   : > { %v335_v29 = vmax.f32 %v334_v28, 0.0 }
  0xb7   : > { %v336_v30 = vadd.f32 1e-05, %v335_v29 }
  0xb9   : > { %577 = vrsqrt.f32 %v336_v30  ;;  %vm343_vm1 = vweird.f32 %v336_v30 }
  0xbf   : > { %v578_v31 = vpop.eup %577 }
  0xc0   : > { %v338_v32 = vmul.f32 %v578_v31, %v336_v30  ;;  %vm344_vm0 = vweird.f32 %v578_v31 }
  0xc1   : > { %vm345_vm2 = vmor %vm343_vm1, %vm344_vm0 }
  0xc2   : > { %v339_v33 = vmul.f32 %v578_v31, %v338_v32 }
  0xc4   : > { %v340_v34 = vmul.f32 0.5, %v339_v33 }
  0xc6   : > { %v341_v35 = vsub.f32 1.5, %v340_v34 }
  0xc8   : > { %v342_v36 = vmul.f32 %v578_v31, %v341_v35 }
  0xca   : > { %v346_v38 = vsel %vm345_vm2, %v578_v31, %v342_v36 }
  0xcb   : > { %v349_v39 = vmul.f32 %v347_v37, %v346_v38  ;;  %v350_v43 = vmul.f32 %v348_v40, %v346_v38 }
  0xcd   : > { %359 = vperm.xlu1 %574, %v349_v39   ;;  %v353_v42 = vmul.f32 %v349_v39, %v331_v24  ;;  %v354_v45 = vmul.f32 %v350_v43, %v331_v24 }
  0xcf   : > { %v355_v44 = vsub.f32 %v351_v41, %v353_v42  ;;  %v356_v47 = vsub.f32 %v352_v46, %v354_v45 }
  0xd1   : > { %373 = vperm.xlu2 %575, %v355_v44  }
  0xd5   : > { %364 = vperm.xlu1 %574, %v350_v43  }
  0xd9   : > { %378 = vperm.xlu2 %575, %v356_v47  }
 0x12b   : > { %v374_v48 = vpop.permute.xlu2 %373 }
 0x133   : > { %v379_v57 = vpop.permute.xlu2 %378 }
 0x13f   : > { %v360_v49 = vpop.permute.xlu1 %359 }
 0x140   : > { %v367_v50 = vmul.f32 %v360_v49, %v313_v8  ;;  %v368_v51 = vmul.f32 %v360_v49, %v314_v9 }
 0x142   : > { %v381_v52 = vadd.f32 %v374_v48, %v367_v50  ;;  %v382_v53 = vadd.f32 %v374_v48, %v368_v51 }
 0x144   : > { %385 = vst [vmem:[%s312_s8] sm:$0xff] %v381_v52 }
 0x145   : > { %386 = vst [vmem:[%s312_s8 + $0x8] sm:$0xff] %v382_v53 }
 0x147   : > { %v365_v54 = vpop.permute.xlu1 %364 }
 0x148   : > { %v369_v55 = vmul.f32 %v365_v54, %v749_v10  ;;  %v370_v56 = vmul.f32 %v365_v54, %v751_v14 }
 0x14a   : > { %v383_v58 = vadd.f32 %v379_v57, %v369_v55  ;;  %v384_v59 = vadd.f32 %v379_v57, %v370_v56 }
 0x14c   : > { %387 = vst [vmem:[%s312_s8 + $0x10] sm:$0xff] %v383_v58 }
 0x14d   : > { %388 = vst [vmem:[%s312_s8 + $0x18] sm:$0xff] %v384_v59 }
 0x14e   : > { %606 = shalt.err (!%p603_p5)
}
 0x14f   : > { %s644_s22 = smov 256   ;;  %s645_s4 = smov 512  }
 0x150   : > { %s646_s5 = smov 16  }
 0x151   : > { %531 = dma.vmem_to_hbm [thread:$0]  (%p709_p6), %s403_s17, 512, %s405_s19, %s390_s16, %s644_s22, %s645_s4, %s646_s5  }
 0x152 PF: > { %s419_s6 = sand.u32 1, %s629_s12   ;;  %p534_p7 = pnand %p511_p9, %p713_p8 }
 0x153   : > { %s420_s7 = scalar_lea.sflag [#allocation6], %s419_s6 }
 0x154   : > { %p535_p10 = pneg %p534_p7 }
 0x156   : > { %624 = dma.done.wait (%p535_p10), %s420_s7, 512  }
 0x157   : > { %626 = vsyncadd (%p535_p10), %s420_s7, 4294966784  ;;  %p13_p11 = scmp.ge.s32.totalorder %s690_s18, 4   ;;  %s808_s12 = smov %s633_s13 }
 0x158   : > { %s809_s13 = smov %s637_s14  ;;  %s810_s14 = smov %s703_s21 }
 0x159   : > { %s811_s15 = smov %s690_s18  ;;  %15 = sbr.rel (!%p13_p11) target bundleno = 3 (0x3), region = 187 }
 0x15e   :  { %426 = vsyncpa [#allocation6], 1 }
 0x15f   :  { %428 = vsyncpa [#allocation6 + $0x1], 1 }

</bundles_post_ra>
